<compile_context>
chip_gen: v7x
topology: tpu7x:2x2x1
jax: 0.10.0
libtpu: 0.0.40
codegen_flags: <defaults>
</compile_context>

<pallas_src>
import jax
import jax.numpy as jnp
from jax.experimental import pallas as pl
from jax.experimental.pallas import tpu as pltpu

NUM_LABELS = 30
NUM_BINARY = 3
PAD_N = 128                      # fused lane-dense width: 3 + 3*30 = 93 -> pad to 128

# lane offsets inside the fused (H, 128) weight / (TB, 128) result slab
_OFF_B = 0                       # binary classifier      lanes [0, 3)
_OFF_0 = NUM_BINARY              # label classifier 0     lanes [3, 33)
_OFF_1 = _OFF_0 + NUM_LABELS     # label classifier 1     lanes [33, 63)
_OFF_2 = _OFF_1 + NUM_LABELS     # label classifier 2     lanes [63, 93)
_USED = _OFF_2 + NUM_LABELS      # 93 used lanes


def _aux2_head_kernel(x_ref, w_ref, b_ref, out_ref, y_ref):
    # FCLayer: dropout (identity in eval) -> linear on tanh(x).
    # All four heads fused -> single lane-dense MXU matmul (TB, H) @ (H, 128).
    x = jnp.tanh(x_ref[...].astype(jnp.float32))
    y_ref[...] = (jnp.dot(x, w_ref[...], preferred_element_type=jnp.float32)
                  + b_ref[...])

    blog = y_ref[:, _OFF_B:_OFF_B + NUM_BINARY]          # (TB, 3)
    l0 = y_ref[:, _OFF_0:_OFF_0 + NUM_LABELS]            # (TB, 30)
    l1 = y_ref[:, _OFF_1:_OFF_1 + NUM_LABELS]            # (TB, 30)
    l2 = y_ref[:, _OFF_2:_OFF_2 + NUM_LABELS]            # (TB, 30)

    # per-row argmax over the 3 binary logits (first-occurrence tie-break,
    # matching torch.argmax)
    max_val = jnp.max(blog, axis=1, keepdims=True)                 # (TB, 1)
    col = jax.lax.broadcasted_iota(jnp.int32, blog.shape, 1)       # (TB, 3)
    sel = jnp.min(jnp.where(blog == max_val, col, NUM_BINARY),
                  axis=1, keepdims=True)                           # (TB, 1)

    # route each row through its selected label classifier: one-hot weighted sum
    oh0 = (sel == 0).astype(jnp.float32)
    oh1 = (sel == 1).astype(jnp.float32)
    oh2 = (sel == 2).astype(jnp.float32)
    sel_logits = l0 * oh0 + l1 * oh1 + l2 * oh2                    # (TB, 30)

    # assemble lane-dense output slab: [ blog | selected logits | zero pad ]
    out_ref[...] = jnp.zeros(out_ref.shape, jnp.float32)
    out_ref[:, _OFF_B:_OFF_B + NUM_BINARY] = blog
    out_ref[:, NUM_BINARY:NUM_BINARY + NUM_LABELS] = sel_logits


def aux2_head(x, params, *, block_rows=512):
    """x: (B, H) pooled features. Returns (binary_logits (B,3), logits (B,30))."""
    B, H = x.shape
    f32 = jnp.float32

    # Fuse the four classifiers into one lane-dense weight/bias (wrapper-side,
    # cheap XLA ops; padded lanes are zero so they never affect results).
    w_cat = jnp.concatenate(
        [params["wb"].astype(f32), params["w0"].astype(f32),
         params["w1"].astype(f32), params["w2"].astype(f32),
         jnp.zeros((H, PAD_N - _USED), f32)], axis=1)              # (H, 128)
    b_cat = jnp.concatenate(
        [params["bb"].reshape(-1).astype(f32),
         params["b0"].reshape(-1).astype(f32),
         params["b1"].reshape(-1).astype(f32),
         params["b2"].reshape(-1).astype(f32),
         jnp.zeros((PAD_N - _USED,), f32)]).reshape(1, PAD_N)      # (1, 128)

    # Batch tile: full batch when small, otherwise 512 rows (multiple of 8);
    # sized so 2x double-buffered x tiles + resident weights fit the default
    # scoped-VMEM limit even on v7x (64 MiB physical / 32 MiB scoped).
    TB = B if B <= block_rows else block_rows
    grid = (pl.cdiv(B, TB),)

    cost = pl.CostEstimate(
        flops=2 * B * H * PAD_N,
        transcendentals=B * H,                                     # tanh
        bytes_accessed=B * H * 4 + H * PAD_N * 4 + PAD_N * 4 + B * PAD_N * 4)

    out = pl.pallas_call(
        _aux2_head_kernel,
        out_shape=jax.ShapeDtypeStruct((B, PAD_N), f32),
        grid=grid,
        in_specs=[
            pl.BlockSpec((TB, H), lambda i: (i, 0)),       # x: tiled over batch
            pl.BlockSpec((H, PAD_N), lambda i: (0, 0)),    # fused weight: resident
            pl.BlockSpec((1, PAD_N), lambda i: (0, 0)),    # fused bias: resident
        ],
        out_specs=pl.BlockSpec((TB, PAD_N), lambda i: (i, 0)),
        scratch_shapes=[pltpu.VMEM((TB, PAD_N), f32)],     # fused matmul result
        compiler_params=pltpu.CompilerParams(
            dimension_semantics=("parallel",)),
        cost_estimate=cost,
    )(x, w_cat, b_cat)

    binary_logits = out[:, :NUM_BINARY]
    logits = out[:, NUM_BINARY:NUM_BINARY + NUM_LABELS]
    return binary_logits, logits


def _reference(x, params):
    xt = jnp.tanh(x)
    blog = xt @ params["wb"] + params["bb"]
    sel = jnp.argmax(blog, axis=1)
    l0 = xt @ params["w0"] + params["b0"]
    l1 = xt @ params["w1"] + params["b1"]
    l2 = xt @ params["w2"] + params["b2"]
    logits = jnp.where(sel[:, None] == 0, l0,
                       jnp.where(sel[:, None] == 1, l1, l2))
    return blog, logits


if __name__ == "__main__":
    B, H = 8, 128  # small: batch=8, hidden=128
    key = jax.random.PRNGKey(0)
    ks = jax.random.split(key, 9)

    x = jax.random.normal(ks[0], (B, H), dtype=jnp.float32)
    scale = 1.0 / jnp.sqrt(H)
    params = {
        "wb": jax.random.normal(ks[1], (H, NUM_BINARY), jnp.float32) * scale,
        "bb": jax.random.normal(ks[2], (NUM_BINARY,), jnp.float32) * 0.01,
        "w0": jax.random.normal(ks[3], (H, NUM_LABELS), jnp.float32) * scale,
        "b0": jax.random.normal(ks[4], (NUM_LABELS,), jnp.float32) * 0.01,
        "w1": jax.random.normal(ks[5], (H, NUM_LABELS), jnp.float32) * scale,
        "b1": jax.random.normal(ks[6], (NUM_LABELS,), jnp.float32) * 0.01,
        "w2": jax.random.normal(ks[7], (H, NUM_LABELS), jnp.float32) * scale,
        "b2": jax.random.normal(ks[8], (NUM_LABELS,), jnp.float32) * 0.01,
    }

    binary_logits, logits = aux2_head(x, params)
    jax.block_until_ready((binary_logits, logits))

    ref_blog, ref_logits = _reference(x, params)
    assert binary_logits.shape == (B, NUM_BINARY)
    assert logits.shape == (B, NUM_LABELS)
    assert jnp.allclose(binary_logits, ref_blog, atol=1e-4, rtol=1e-4)
    assert jnp.allclose(logits, ref_logits, atol=1e-4, rtol=1e-4)

    print("KERNEL_OK")
</pallas_src>

<mosaic_0001>
module attributes {stable_mosaic.version = 11 : i64} {
  func.func @_aux2_head_kernel(%arg0: i32, %arg1: memref<8x128xf32, #tpu.memory_space<vmem>>, %arg2: memref<128x128xf32, #tpu.memory_space<vmem>>, %arg3: memref<1x128xf32, #tpu.memory_space<vmem>>, %arg4: memref<8x128xf32, #tpu.memory_space<vmem>>, %arg5: memref<8x128xf32, #tpu.memory_space<vmem>>) attributes {dimension_semantics = [#tpu.dimension_semantics<parallel>], iteration_bounds = array<i64: 1>, scalar_prefetch = 0 : i64, scratch_operands = 1 : i64, tpu.core_type = #tpu.core_type<tc>, window_params = [{transform_indices = @transform_0, window_bounds = array<i64: 8, 128>}, {pipeline_mode = #tpu.pipeline_mode<synchronous>, transform_indices = @transform_1, window_bounds = array<i64: 128, 128>}, {pipeline_mode = #tpu.pipeline_mode<synchronous>, transform_indices = @transform_2, window_bounds = array<i64: 1, 128>}, {transform_indices = @transform_3, window_bounds = array<i64: 8, 128>}]} {
    %c0 = arith.constant 0 : index
    %c0_0 = arith.constant 0 : index
    %0 = vector.load %arg1[%c0, %c0_0] : memref<8x128xf32, #tpu.memory_space<vmem>>, vector<8x128xf32>
    %1 = math.tanh %0 : vector<8x128xf32>
    %c0_1 = arith.constant 0 : index
    %c0_2 = arith.constant 0 : index
    %2 = vector.load %arg2[%c0_1, %c0_2] : memref<128x128xf32, #tpu.memory_space<vmem>>, vector<128x128xf32>
    %cst = arith.constant dense<0.000000e+00> : vector<8x128xf32>
    %3 = tpu.matmul %1, %2, %cst {dimension_numbers = #tpu.dot_dimension_numbers<[1], [0], [0], [1], [0, 0, 1, 1], [], []>} : vector<8x128xf32>, vector<128x128xf32>, vector<8x128xf32> -> vector<8x128xf32>
    %c0_3 = arith.constant 0 : index
    %c0_4 = arith.constant 0 : index
    %4 = vector.load %arg3[%c0_3, %c0_4] : memref<1x128xf32, #tpu.memory_space<vmem>>, vector<1x128xf32>
    %5 = vector.broadcast %4 : vector<1x128xf32> to vector<8x128xf32>
    %6 = arith.addf %3, %5 : vector<8x128xf32>
    %c0_5 = arith.constant 0 : index
    %c0_6 = arith.constant 0 : index
    %7 = vector.load %arg5[%c0_5, %c0_6] : memref<8x128xf32, #tpu.memory_space<vmem>>, vector<8x128xf32>
    tpu.vector_store %arg5[%c0_5, %c0_6], %6 {strides = array<i32>} : memref<8x128xf32, #tpu.memory_space<vmem>>, vector<8x128xf32>,
    %c0_7 = arith.constant 0 : index
    %c0_8 = arith.constant 0 : index
    %8 = vector.load %arg5[%c0_7, %c0_8] : memref<8x128xf32, #tpu.memory_space<vmem>>, vector<8x3xf32>
    %c0_9 = arith.constant 0 : index
    %c3 = arith.constant 3 : index
    %9 = vector.load %arg5[%c0_9, %c3] : memref<8x128xf32, #tpu.memory_space<vmem>>, vector<8x30xf32>
    %c0_10 = arith.constant 0 : index
    %c33 = arith.constant 33 : index
    %10 = vector.load %arg5[%c0_10, %c33] : memref<8x128xf32, #tpu.memory_space<vmem>>, vector<8x30xf32>
    %c0_11 = arith.constant 0 : index
    %c63 = arith.constant 63 : index
    %11 = vector.load %arg5[%c0_11, %c63] : memref<8x128xf32, #tpu.memory_space<vmem>>, vector<8x30xf32>
    %cst_12 = arith.constant dense<0xFF800000> : vector<8xf32>
    %12 = vector.multi_reduction <maximumf>, %8, %cst_12 [1] : vector<8x3xf32> to vector<8xf32>
    %13 = vector.shape_cast %12 : vector<8xf32> to vector<8x1xf32>
    %14 = tpu.iota {dimensions = array<i32: 1>} : vector<8x3xi32>
    %15 = vector.broadcast %13 : vector<8x1xf32> to vector<8x3xf32>
    %16 = arith.cmpf oeq, %8, %15 : vector<8x3xf32>
    %c3_i32 = arith.constant 3 : i32
    %17 = vector.broadcast %c3_i32 : i32 to vector<8x3xi32>
    %18 = arith.select %16, %14, %17 : vector<8x3xi1>, vector<8x3xi32>
    %cst_13 = arith.constant dense<2147483647> : vector<8xi32>
    %19 = vector.multi_reduction <minsi>, %18, %cst_13 [1] : vector<8x3xi32> to vector<8xi32>
    %20 = vector.shape_cast %19 : vector<8xi32> to vector<8x1xi32>
    %c0_i32 = arith.constant 0 : i32
    %21 = vector.broadcast %c0_i32 : i32 to vector<8x1xi32>
    %22 = arith.cmpi eq, %20, %21 : vector<8x1xi32>
    %23 = arith.extui %22 : vector<8x1xi1> to vector<8x1xi32>
    %24 = arith.sitofp %23 : vector<8x1xi32> to vector<8x1xf32>
    %c1_i32 = arith.constant 1 : i32
    %25 = vector.broadcast %c1_i32 : i32 to vector<8x1xi32>
    %26 = arith.cmpi eq, %20, %25 : vector<8x1xi32>
    %27 = arith.extui %26 : vector<8x1xi1> to vector<8x1xi32>
    %28 = arith.sitofp %27 : vector<8x1xi32> to vector<8x1xf32>
    %c2_i32 = arith.constant 2 : i32
    %29 = vector.broadcast %c2_i32 : i32 to vector<8x1xi32>
    %30 = arith.cmpi eq, %20, %29 : vector<8x1xi32>
    %31 = arith.extui %30 : vector<8x1xi1> to vector<8x1xi32>
    %32 = arith.sitofp %31 : vector<8x1xi32> to vector<8x1xf32>
    %33 = vector.broadcast %24 : vector<8x1xf32> to vector<8x30xf32>
    %34 = arith.mulf %9, %33 : vector<8x30xf32>
    %35 = vector.broadcast %28 : vector<8x1xf32> to vector<8x30xf32>
    %36 = arith.mulf %10, %35 : vector<8x30xf32>
    %37 = arith.addf %34, %36 : vector<8x30xf32>
    %38 = vector.broadcast %32 : vector<8x1xf32> to vector<8x30xf32>
    %39 = arith.mulf %11, %38 : vector<8x30xf32>
    %40 = arith.addf %37, %39 : vector<8x30xf32>
    %cst_14 = arith.constant 0.000000e+00 : f32
    %41 = vector.broadcast %cst_14 : f32 to vector<8x128xf32>
    %c0_15 = arith.constant 0 : index
    %c0_16 = arith.constant 0 : index
    %42 = vector.load %arg4[%c0_15, %c0_16] : memref<8x128xf32, #tpu.memory_space<vmem>>, vector<8x128xf32>
    tpu.vector_store %arg4[%c0_15, %c0_16], %41 {strides = array<i32>} : memref<8x128xf32, #tpu.memory_space<vmem>>, vector<8x128xf32>,
    %c0_17 = arith.constant 0 : index
    %c0_18 = arith.constant 0 : index
    %43 = vector.load %arg4[%c0_17, %c0_18] : memref<8x128xf32, #tpu.memory_space<vmem>>, vector<8x3xf32>
    tpu.vector_store %arg4[%c0_17, %c0_18], %8 {strides = array<i32>} : memref<8x128xf32, #tpu.memory_space<vmem>>, vector<8x3xf32>,
    %c0_19 = arith.constant 0 : index
    %c3_20 = arith.constant 3 : index
    %44 = vector.load %arg4[%c0_19, %c3_20] : memref<8x128xf32, #tpu.memory_space<vmem>>, vector<8x30xf32>
    tpu.vector_store %arg4[%c0_19, %c3_20], %40 {strides = array<i32>} : memref<8x128xf32, #tpu.memory_space<vmem>>, vector<8x30xf32>,
    return
  }
  func.func @transform_0(%arg0: i32) -> (i32, i32) {
    %c0_i32 = arith.constant 0 : i32
    %c0_i32_0 = arith.constant 0 : i32
    return %arg0, %c0_i32 : i32, i32
  }
  func.func @transform_1(%arg0: i32) -> (i32, i32) {
    %c0_i32 = arith.constant 0 : i32
    %c0_i32_0 = arith.constant 0 : i32
    %c0_i32_1 = arith.constant 0 : i32
    return %c0_i32, %c0_i32_0 : i32, i32
  }
  func.func @transform_2(%arg0: i32) -> (i32, i32) {
    %c0_i32 = arith.constant 0 : i32
    %c0_i32_0 = arith.constant 0 : i32
    %c0_i32_1 = arith.constant 0 : i32
    return %c0_i32, %c0_i32_0 : i32, i32
  }
  func.func @transform_3(%arg0: i32) -> (i32, i32) {
    %c0_i32 = arith.constant 0 : i32
    %c0_i32_0 = arith.constant 0 : i32
    return %arg0, %c0_i32 : i32, i32
  }
}

</mosaic_0001>

<bundles_post_ra>
// kernel: tpu_custom_call.1
= control target key start
LH: loop header
LB: loop body
LE: loop exit
PB: predicated region body
PF: predicated region fallthrough
CT: control target
= control target key end

     0   :  { %8 = vsyncpa [#allocation4], 0  ;;  %s448_s0 = inlined_call_operand.hbm [shape: f32[8,128], index: 0, kind: input, shape index: {}]   ;;  %s449_s1 = inlined_call_operand.hbm [shape: f32[128,128], index: 1, kind: input, shape index: {}]   ;;  %s450_s2 = inlined_call_operand.vmem [shape: f32[1,128], index: 2, kind: input, shape index: {}]   ;;  %s451_s3 = inlined_call_operand.hbm [shape: f32[8,128], index: 3, kind: output, shape index: {}]  }
   0x1   :  { %9 = vsyncpa [#allocation7], 0 }
   0x2   :  { %10 = vsyncpa [#allocation5], 0  ;;  %s367_s12 = smov [#allocation3]   ;;  %s368_s14 = smov [#allocation6]  }
   0x3   :  { %s17_s13 = sshll.u32 %s367_s12, 4  ;;  %s26_s15 = sshll.u32 %s368_s14, 4  ;;  %s18_s13 = int_to_ptr.vmem [resolvable:$true] %s17_s13  ;;  %s397_s15 = int_to_ptr.vmem [resolvable:$true] %s26_s15 }
   0x4   :  { %s295_s18 = scalar_lea.hbm %s448_s0, 128 }
   0x5   :  { %p296_p0 = scmp.ne.s32.totalorder %s448_s0, %s295_s18  ;;  %p299_p1 = scmp.lt.u32.totalorder %s295_s18, %s448_s0 }
   0x7   :  { %p301_p2 = pnand %p299_p1, %p296_p0 }
   0x9   :  { %304 = shalt.err (!%p301_p2)
}
   0xa   :  { %s305_s23 = scalar_lea.vmem %s18_s13, 128  ;;  %p310_p4 = scmp.lt.s32.totalorder %s18_s13, %s18_s13 }
   0xb   :  { %p306_p3 = scmp.ne.s32.totalorder %s18_s13, %s305_s23  ;;  %p311_p5 = scmp.lt.s32.totalorder %s305_s23, %s305_s23 }
   0xd   :  { %p312_p6 = por %p311_p5, %p310_p4 }
   0xf   :  { %p313_p7 = pnand %p312_p6, %p306_p3 }
  0x11   :  { %316 = shalt.err (!%p313_p7)
}
  0x12   :  { %20 = dma.hbm_to_vmem [thread:$0]  %s448_s0, 128, %s18_s13, [#allocation4]  }
  0x13   :  { %s317_s28 = scalar_lea.hbm %s449_s1, 2048 }
  0x14   :  { %p318_p8 = scmp.ne.s32.totalorder %s449_s1, %s317_s28  ;;  %p321_p9 = scmp.lt.u32.totalorder %s317_s28, %s449_s1 }
  0x16   :  { %p323_p10 = pnand %p321_p9, %p318_p8 }
  0x18   :  { %326 = shalt.err (!%p323_p10)
}
  0x19   :  { %s327_s6 = scalar_lea.vmem %s397_s15, 2048  ;;  %p332_p12 = scmp.lt.s32.totalorder %s397_s15, %s397_s15 }
  0x1a   :  { %p328_p11 = scmp.ne.s32.totalorder %s397_s15, %s327_s6  ;;  %p333_p13 = scmp.lt.s32.totalorder %s327_s6, %s327_s6 }
  0x1c   :  { %p334_p0 = por %p333_p13, %p332_p12 }
  0x1e   :  { %p335_p1 = pnand %p334_p0, %p328_p11 }
  0x20   :  { %338 = shalt.err (!%p335_p1)
}
  0x21   :  { %s369_s0 = smov 128   ;;  %s370_s7 = smov 8  }
  0x22   :  { %32 = dma.hbm_to_vmem [thread:$0]  %s449_s1, 2048, %s397_s15, [#allocation7], %s369_s0, %s369_s0, %s370_s7  }
  0x23   :  { %361 = dma.done.wait [#allocation4], 128  }
  0x24   :  { %362 = vsyncadd [#allocation4], 4294967168 }
  0x25   :  { %363 = dma.done.wait [#allocation7], 2048  }
  0x26   :  { %364 = vsyncadd [#allocation7], 4294965248  ;;  %v371_v0 = vmov 0.0|0.0   ;;  %vm372_vm0 = vmmov 0   ;;  %v373_v1 = vmov 0.0   ;;  %v43_v2 = vld [vmem:[#allocation6] sm:$0xff]  ;;  %v142_v33 = vlaneseq }
  0x27   :  { %259 = vmatprep.subr.bf16.mxu0 %v371_v0  ;;  %256 = vmatprep.mubr.msk.f32.mxu0 %vm372_vm0, %v373_v1  ;;  %183 = vst [vmem:[#allocation8] sm:$0xff] %v373_v1  ;;  %v44_v3 = vld [vmem:[#allocation6 + $0x8] sm:$0xff]  ;;  %v45_v4 = vld [vmem:[#allocation6 + $0x10] sm:$0xff]  ;;  %v46_v6 = vld [vmem:[#allocation6 + $0x18] sm:$0xff]  ;;  %vm138_vm1 = vcmask 23552   ;;  %s375_s11 = smov 98  }
  0x28   :  { %v260_v5 = vpack.c.bf16 %v44_v3, %v43_v2  ;;  %v263_v7 = vpack.c.bf16 %v46_v6, %v45_v4  ;;  %v47_v8 = vld [vmem:[#allocation6 + $0x20] sm:$0xff]  ;;  %v48_v9 = vld [vmem:[#allocation6 + $0x28] sm:$0xff]  ;;  %v49_v11 = vld [vmem:[#allocation6 + $0x30] sm:$0xff]  ;;  %v143_v34 = vand.u32 127, %v142_v33  ;;  %s376_s12 = smov [#allocation8]   ;;  %vm185_vm7 = vcmask 269336  }
  0x29   :  { %v266_v10 = vpack.c.bf16 %v48_v9, %v47_v8  ;;  %v50_v12 = vld [vmem:[#allocation6 + $0x38] sm:$0xff]  ;;  %v51_v14 = vld [vmem:[#allocation6 + $0x40] sm:$0xff]  ;;  %v52_v15 = vld [vmem:[#allocation6 + $0x48] sm:$0xff]  ;;  %s193_s13 = sshll.u32 %s376_s12, 4  ;;  %s194_s13 = int_to_ptr.vmem [resolvable:$true] %s193_s13 }
  0x2a   :  { %261 = vmatpush3.bf16.msra.mxu0 %v260_v5  ;;  %v269_v13 = vpack.c.bf16 %v50_v12, %v49_v11  ;;  %v272_v16 = vpack.c.bf16 %v52_v15, %v51_v14  ;;  %v53_v17 = vld [vmem:[#allocation6 + $0x50] sm:$0xff]  ;;  %v54_v18 = vld [vmem:[#allocation6 + $0x58] sm:$0xff]  ;;  %v55_v21 = vld [vmem:[#allocation6 + $0x60] sm:$0xff]  ;;  %s339_s14 = scalar_lea.vmem %s194_s13, 128  ;;  %p344_p3 = scmp.lt.s32.totalorder %s194_s13, %s194_s13 }
  0x2b   :  { %262 = vmatprep.subr.bf16.mxu0 %v371_v0  ;;  %v41_v19 = vld [vmem:[#allocation3] sm:$0xff]  ;;  %v275_v20 = vpack.c.bf16 %v54_v18, %v53_v17  ;;  %v56_v22 = vld [vmem:[#allocation6 + $0x68] sm:$0xff]  ;;  %v57_v24 = vld [vmem:[#allocation6 + $0x70] sm:$0xff]  ;;  %p340_p2 = scmp.ne.s32.totalorder %s194_s13, %s339_s14  ;;  %p345_p4 = scmp.lt.s32.totalorder %s339_s14, %s339_s14 }
  0x2c   :  { %293 = vtanh.f32 %v41_v19  ;;  %v278_v23 = vpack.c.bf16 %v56_v22, %v55_v21  ;;  %v58_v25 = vld [vmem:[#allocation6 + $0x78] sm:$0xff] }
  0x2d   :  { %v281_v26 = vpack.c.bf16 %v58_v25, %v57_v24  ;;  %v203_v28 = vld [vmem:[%s450_s2] ss:$0 sm:$0xff]  ;;  %s374_s2 = smov 68   ;;  %p346_p5 = por %p345_p4, %p344_p3 }
  0x2e   :  { %264 = vmatpush3.bf16.msra.mxu0 %v263_v7 }
  0x2f   :  { %265 = vmatprep.subr.bf16.mxu0 %v371_v0  ;;  %p347_p6 = pnand %p346_p5, %p340_p2 }
  0x32   :  { %267 = vmatpush3.bf16.msra.mxu0 %v266_v10 }
  0x33   :  { %268 = vmatprep.subr.bf16.mxu0 %v371_v0 }
  0x36   :  { %270 = vmatpush3.bf16.msra.mxu0 %v269_v13  ;;  %v294_v27 = vpop.eup %293 }
  0x37   :  { %271 = vmatprep.subr.bf16.mxu0 %v371_v0 }
  0x3a   :  { %273 = vmatpush3.bf16.msra.mxu0 %v272_v16 }
  0x3b   :  { %274 = vmatprep.subr.bf16.mxu0 %v371_v0 }
  0x3e   :  { %276 = vmatpush3.bf16.msra.mxu0 %v275_v20 }
  0x3f   :  { %277 = vmatprep.subr.bf16.mxu0 %v371_v0 }
  0x42   :  { %279 = vmatpush3.bf16.msra.mxu0 %v278_v23 }
  0x43   :  { %280 = vmatprep.subr.bf16.mxu0 %v371_v0 }
  0x46   :  { %282 = vmatpush3.bf16.msra.mxu0 %v281_v26 }
  0x49   :  { %257 = vmatmul.mubr.f32.vlgmr.msra.gmra.mrb[0].mxu0 %v294_v27 }
 0x11c   :  { %v132_v29 = vpop.f32.mrb[0].mxu0 }
 0x11d   :  { %v133_v30 = vadd.f32 %v203_v28, %v132_v29  ;;  %v258_v31 = vpop.f32.mrb[1].mxu0 }
 0x11f   :  { %v139_v32 = vsel %vm138_vm1, %v133_v30, -inf  ;;  %184 = vst.msk [vmem:[#allocation8] sm:$0xff] %vm138_vm1, %v133_v30 }
 0x120   :  { %140 = vmax.xlane.f32.xlu0 %v139_v32 }
 0x1ad   :  { %v141_v35 = vpop.xlane.xlu0 %140 }
 0x1ae   :  { %vm144_vm2 = vcmp.eq.f32.partialorder %v133_v30, %v141_v35 }
 0x1af   :  { %v145_v36 = vsel %vm144_vm2, %v143_v34, 3 }
 0x1b0   :  { %v146_v37 = vsel %vm138_vm1, %v145_v36, 2147483647 }
 0x1b1   :  { %v148_v38 = vshra.s32 %v146_v37, 16  ;;  %v147_v40 = vand.u32 65535, %v146_v37 }
 0x1b3   :  { %v150_v39 = vcvt.s32.f32 %v148_v38  ;;  %v149_v42 = vcvt.s32.f32 %v147_v40 }
 0x1b5   :  { %151 = vmin.xlane.f32.xlu0 %v150_v39 }
 0x242   :  { %v152_v41 = vpop.xlane.xlu0 %151 }
 0x243   :  { %vm153_vm3 = vcmp.eq.f32.partialorder %v150_v39, %v152_v41  ;;  %v158_v44 = vcvt.f32.s32 %v152_v41 }
 0x244   :  { %v154_v43 = vsel %vm153_vm3, %v149_v42, inf }
 0x245   :  { %155 = vmin.xlane.f32.xlu1 %v154_v43  ;;  %v159_v46 = vshll.u32 %v158_v44, 16 }
 0x2d2   :  { %v156_v45 = vpop.xlane.xlu1 %155 }
 0x2d3   :  { %v157_v47 = vcvt.f32.s32 %v156_v45 }
 0x2d5   :  { %v160_v48 = vadd.s32 %v159_v46, %v157_v47 }
 0x2d7   :  { %vm167_vm4 = vcmp.eq.s32.totalorder %v160_v48, 2  ;;  %vm164_vm5 = vcmp.eq.s32.totalorder %v160_v48, 1  ;;  %vm161_vm6 = vcmp.eq.s32.totalorder %v160_v48, 0 }
 0x2d8   :  { %v206_v49 = vsel %vm167_vm4, 1.0, %v373_v1  ;;  %v205_v50 = vsel %vm164_vm5, 1.0, %v373_v1  ;;  %v204_v53 = vsel %vm161_vm6, 1.0, %v373_v1 }
 0x2d9   :  { %v177_v51 = vmul.f32 %v206_v49, %v133_v30  ;;  %v171_v52 = vmul.f32 %v205_v50, %v133_v30  ;;  %v170_v54 = vmul.f32 %v204_v53, %v133_v30 }
 0x2db   :  { %179 = vrot.lane.b32.xlu0 %v177_v51, %s374_s2  ;;  %173 = vrot.lane.b32.xlu1 %v171_v52, %s375_s11 }
 0x34d   :  { %v174_v55 = vpop.permute.xlu1 %173  ;;  %v180_v57 = vpop.permute.xlu0 %179 }
 0x34e   :  { %v176_v56 = vadd.f32 %v174_v55, %v170_v54 }
 0x350   :  { %v182_v58 = vadd.f32 %v180_v57, %v176_v56 }
 0x352   :  { %186 = vst.msk [vmem:[#allocation8] sm:$0xff] %vm185_vm7, %v182_v58 }
 0x353   :  { %350 = shalt.err (!%p347_p6)
}
 0x354   :  { %s351_s17 = scalar_lea.hbm %s451_s3, 128 }
 0x355   :  { %p352_p7 = scmp.ne.s32.totalorder %s451_s3, %s351_s17  ;;  %p355_p8 = scmp.lt.u32.totalorder %s351_s17, %s451_s3 }
 0x357   :  { %p357_p9 = pnand %p355_p8, %p352_p7 }
 0x359   :  { %360 = shalt.err (!%p357_p9)
}
 0x35a   :  { %196 = dma.vmem_to_hbm [thread:$0]  %s194_s13, 128, %s451_s3, [#allocation5]  }
 0x35b   :  { %365 = dma.done.wait [#allocation5], 128  }
 0x35c   :  { %366 = vsyncadd [#allocation5], 4294967168 }
 0x35d   :  { %200 = vsyncpa [#allocation4], 1 }
 0x35e   :  { %201 = vsyncpa [#allocation7], 1 }
 0x35f   :  { %202 = vsyncpa [#allocation5], 1 }

</bundles_post_ra>
